<compile_context>
chip_gen: v5e
topology: v5e:2x2
jax: 0.10.0
libtpu: 0.0.40
codegen_flags: <defaults>
</compile_context>

<pallas_src>
import jax
import jax.numpy as jnp
import numpy as np
from jax.experimental import pallas as pl
from jax.experimental.pallas import tpu as pltpu

D = 768        # xlm_output_size
NUM_TAGS = 16  # len(pp.tagset) — synthetic tagset size


def _tagger_kernel(wid_ref, cont_ref, emb_ref, w_ref, b_ref, out_ref):
    TB = emb_ref.shape[0]
    S = emb_ref.shape[1]
    Dh = emb_ref.shape[2]
    W = out_ref.shape[1]
    T = out_ref.shape[2]

    wid = wid_ref[...]                       # [TB, 1, S] int32 (-1 == pad/None)
    cont_b = cont_ref[...] > 0               # [TB, 1, S] bool: subword continues its word

    # membership: mask[b, w, s] = (subword s belongs to word w); -1 never matches,
    # so padded subwords fall out for free (no extra valid-mask multiply).
    row_ids = jax.lax.broadcasted_iota(jnp.int32, (TB, W, S), 1)
    mask = row_ids == wid                    # [TB, W, S] bool

    # number of "continuation" subwords per word (== k-1 for a k-subword word)
    cc = jnp.sum(jnp.where(mask, cont_b.astype(jnp.float32), 0.0),
                 axis=2, keepdims=True)      # [TB, W, 1]
    inv_cc = pl.reciprocal(jnp.maximum(cc, 1.0), approx=True)   # EUP slot, ~free
    single = jnp.where(cc == 0.0, 1.0, 0.0)

    # Reproduce the reference loop exactly: a multi-subword word averages its
    # first k-1 subwords (last subword dropped); single-subword words pass
    # through; absent/padding word rows stay all-zero (-> logits == bias).
    scale = jnp.where(cont_b, inv_cc, single)                    # [TB, W, S]
    weight = jnp.where(mask, scale, 0.0).astype(jnp.bfloat16)    # [TB, W, S]

    # Reassociated linear-before-pooling:
    #   proj = emb @ W^T on the MXU (bf16 operands, f32 accumulate),
    #   then the tiny batched pooling matmul (bf16 operands, f32 accumulate).
    emb2 = emb_ref[...].reshape(TB * S, Dh)                      # already bf16
    proj = jnp.dot(emb2, w_ref[...], preferred_element_type=jnp.float32)
    proj = proj.reshape(TB, S, T).astype(jnp.bfloat16)

    logits = jnp.einsum('bws,bst->bwt', weight, proj,
                        preferred_element_type=jnp.float32) + b_ref[...]
    out_ref[...] = logits.astype(out_ref.dtype)


def _next_pow2(x):
    p = 1
    while p < x:
        p *= 2
    return p


def model_forward(embeddings, word_ids, lin_w, lin_b, *, batch_block=None):
    """embeddings: [B,S,D] (XLM-R last_hidden_state with the CLS token dropped),
    word_ids: [B,S] int (HF word_ids()[1:], -1 == None) — host data from the tokenizer,
    lin_w: [T,D] nn.Linear weight, lin_b: [T] nn.Linear bias.
    Returns logits [B, max_words_in_batch, T] (matches F.pad + nn.Linear, eval mode)."""
    B, S, Dh = embeddings.shape
    T = lin_w.shape[0]

    # Host-side word_ids come straight from the tokenizer: no device sync.
    # They only shape the final slice / W_pad bucket, never the kernel trace shape
    # beyond a power-of-two bucket (bounded recompiles).
    wid_host = np.asarray(word_ids, dtype=np.int32)
    max_rows = max(int(wid_host.max()) + 1, 1)

    # Bucketed, sublane-aligned word dimension: power-of-two upper bound of the
    # batch-max word count, capped by the worst case round_up(S, 8).
    s_pad = ((S + 7) // 8) * 8
    W_pad = min(max(8, _next_pow2(max_rows)), s_pad)

    wid = jnp.asarray(wid_host)
    # reference breaks at the first None: mask everything at/after the first -1
    before_pad = jnp.cumprod((wid >= 0).astype(jnp.int32), axis=1)
    wid = jnp.where(before_pad == 1, wid, -1)
    cont = jnp.pad(
        ((wid[:, :-1] >= 0) & (wid[:, :-1] == wid[:, 1:])).astype(jnp.int32),
        ((0, 0), (0, 1)))

    # Stream the dominant tensor in bf16 (ideally the encoder already emits bf16;
    # the kernel's MXU math was bf16 anyway, so results match bit-for-bit).
    emb = embeddings if embeddings.dtype == jnp.bfloat16 else embeddings.astype(jnp.bfloat16)

    # --- VMEM-budget-driven batch block (generation aware) -------------------
    vmem_cap = 64 << 20                              # conservative default (v7x per-TC)
    try:
        vmem_cap = int(getattr(pltpu.get_tpu_info(), "vmem_capacity_bytes", vmem_cap))
    except Exception:
        pass
    vmem_limit = max(32 << 20, min(vmem_cap - (16 << 20), 100 << 20))
    budget = int(vmem_limit * 0.8)

    per_sent = (
        2 * S * Dh * emb.dtype.itemsize   # double-buffered embedding tile
        + 2 * 2 * S * 4                   # double-buffered word-id / continuation tiles
        + 2 * W_pad * T * 4               # double-buffered output tile
        + 3 * W_pad * S * 4               # mask / scale / pooling-weight intermediates
        + S * T * 6                       # proj (f32 + bf16 copy)
    )
    tb = max(1, min(B, budget // max(per_sent, 1)))
    if batch_block is not None:
        tb = min(tb, max(1, int(batch_block)))
    if B >= 2:                            # >= 2 grid steps: batch sharding over both TCs (v7x)
        tb = min(tb, (B + 1) // 2)
    if B >= 8:                            # extra pipeline depth when the batch allows it
        tb = min(tb, (B + 3) // 4)
    B_pad = ((B + tb - 1) // tb) * tb

    wid3 = wid[:, None, :]                # [B, 1, S] so block shapes never hit the (8,128) rule
    cont3 = cont[:, None, :]
    if B_pad != B:
        emb = jnp.pad(emb, ((0, B_pad - B), (0, 0), (0, 0)))
        wid3 = jnp.pad(wid3, ((0, B_pad - B), (0, 0), (0, 0)), constant_values=-1)
        cont3 = jnp.pad(cont3, ((0, B_pad - B), (0, 0), (0, 0)))

    # nn.Linear parameters: transpose once, feed the MXU bf16 (f32 accumulate).
    w_t = jnp.asarray(lin_w).T.astype(jnp.bfloat16)           # [D, T]
    b2 = jnp.asarray(lin_b, jnp.float32).reshape(1, T)

    grid_spec = pltpu.PrefetchScalarGridSpec(
        num_scalar_prefetch=0,
        grid=(B_pad // tb,),
        in_specs=[
            pl.BlockSpec((tb, 1, S), lambda g: (g, 0, 0)),     # word ids (per block)
            pl.BlockSpec((tb, 1, S), lambda g: (g, 0, 0)),     # continuation mask (per block)
            pl.BlockSpec((tb, S, Dh), lambda g: (g, 0, 0)),    # embeddings (per block)
            pl.BlockSpec((Dh, T), lambda g: (0, 0)),           # linear weight^T (resident)
            pl.BlockSpec((1, T), lambda g: (0, 0)),            # linear bias (resident)
        ],
        out_specs=pl.BlockSpec((tb, W_pad, T), lambda g: (g, 0, 0)),
    )
    out = pl.pallas_call(
        _tagger_kernel,
        out_shape=jax.ShapeDtypeStruct((B_pad, W_pad, T), jnp.float32),
        grid_spec=grid_spec,
        compiler_params=pltpu.CompilerParams(
            dimension_semantics=("parallel",),   # independent sentences: megacore on v7x
            vmem_limit_bytes=vmem_limit,
        ),
    )(wid3, cont3, emb, w_t, b2)

    return out[:B, :min(max_rows, W_pad), :]


if __name__ == "__main__":
    key = jax.random.PRNGKey(0)
    B, S = 2, 16
    k1, k2, k3 = jax.random.split(key, 3)

    # Synthetic XLM-RoBERTa last_hidden_state (CLS already dropped).
    # TODO(synk): the pretrained XLM-RoBERTa encoder + HF tokenizer have no Pallas equivalent.
    embeddings = jax.random.normal(k1, (B, S, D), dtype=jnp.float32)

    # Synthetic HF-style word_ids(batch_index=i)[1:] with -1 standing in for None.
    word_ids = np.full((B, S), -1, dtype=np.int32)
    word_ids[0, :10] = [0, 0, 1, 2, 2, 2, 3, 4, 5, 5]
    word_ids[1, :13] = [0, 1, 1, 2, 3, 3, 3, 3, 4, 5, 6, 7, 8]

    # Deterministic nn.Linear(768, num_tags) parameters.
    bound = 1.0 / np.sqrt(D)
    lin_w = jax.random.uniform(k2, (NUM_TAGS, D), minval=-bound, maxval=bound, dtype=jnp.float32)
    lin_b = jax.random.uniform(k3, (NUM_TAGS,), minval=-bound, maxval=bound, dtype=jnp.float32)

    out = model_forward(embeddings, word_ids, lin_w, lin_b)
    out = jax.block_until_ready(out)

    # Pure-numpy reference of the original word pooling + pad + linear (eval mode).
    emb_np = np.asarray(embeddings)
    pooled_list = []
    for i in range(B):
        buff, rows = [], []
        wids = word_ids[i]
        for j, val in enumerate(wids):
            if val < 0:
                break
            elif j + 1 < len(wids) and val == wids[j + 1]:
                buff.append(emb_np[i, j])
            elif len(buff) > 0:
                rows.append(np.mean(np.stack(buff), axis=0))
                buff = []
            else:
                rows.append(emb_np[i, j])
        pooled_list.append(np.stack(rows))
    max_rows = max(r.shape[0] for r in pooled_list)
    ref = np.stack([np.pad(r, ((0, max_rows - r.shape[0]), (0, 0))) for r in pooled_list])
    ref = ref @ np.asarray(lin_w).T + np.asarray(lin_b)

    np.testing.assert_allclose(np.asarray(out), ref, rtol=2e-2, atol=2e-2)
    print("KERNEL_OK")
</pallas_src>

<mosaic_0001>
module attributes {stable_mosaic.version = 11 : i64} {
  func.func @_tagger_kernel(%arg0: i32, %arg1: memref<1x1x16xi32, #tpu.memory_space<vmem>>, %arg2: memref<1x1x16xi32, #tpu.memory_space<vmem>>, %arg3: memref<1x16x768xbf16, #tpu.memory_space<vmem>>, %arg4: memref<768x16xbf16, #tpu.memory_space<vmem>>, %arg5: memref<1x16xf32, #tpu.memory_space<vmem>>, %arg6: memref<1x16x16xf32, #tpu.memory_space<vmem>>) attributes {dimension_semantics = [#tpu.dimension_semantics<parallel>], iteration_bounds = array<i64: 2>, scalar_prefetch = 0 : i64, scratch_operands = 0 : i64, tpu.core_type = #tpu.core_type<tc>, window_params = [{transform_indices = @transform_0, window_bounds = array<i64: 1, 1, 16>}, {transform_indices = @transform_1, window_bounds = array<i64: 1, 1, 16>}, {transform_indices = @transform_2, window_bounds = array<i64: 1, 16, 768>}, {pipeline_mode = #tpu.pipeline_mode<synchronous>, transform_indices = @transform_3, window_bounds = array<i64: 768, 16>}, {pipeline_mode = #tpu.pipeline_mode<synchronous>, transform_indices = @transform_4, window_bounds = array<i64: 1, 16>}, {transform_indices = @transform_5, window_bounds = array<i64: 1, 16, 16>}]} {
    %c0 = arith.constant 0 : index
    %c0_0 = arith.constant 0 : index
    %c0_1 = arith.constant 0 : index
    %0 = vector.load %arg1[%c0, %c0_0, %c0_1] : memref<1x1x16xi32, #tpu.memory_space<vmem>>, vector<1x1x16xi32>
    %c0_2 = arith.constant 0 : index
    %c0_3 = arith.constant 0 : index
    %c0_4 = arith.constant 0 : index
    %1 = vector.load %arg2[%c0_2, %c0_3, %c0_4] : memref<1x1x16xi32, #tpu.memory_space<vmem>>, vector<1x1x16xi32>
    %c0_i32 = arith.constant 0 : i32
    %2 = vector.broadcast %c0_i32 : i32 to vector<1x1x16xi32>
    %3 = arith.cmpi sgt, %1, %2 : vector<1x1x16xi32>
    %4 = tpu.iota {dimensions = array<i32: 1>} : vector<1x16x16xi32>
    %5 = vector.broadcast %0 : vector<1x1x16xi32> to vector<1x16x16xi32>
    %6 = arith.cmpi eq, %4, %5 : vector<1x16x16xi32>
    %7 = arith.extui %3 : vector<1x1x16xi1> to vector<1x1x16xi32>
    %8 = arith.sitofp %7 : vector<1x1x16xi32> to vector<1x1x16xf32>
    %cst = arith.constant 0.000000e+00 : f32
    %9 = vector.shape_cast %8 : vector<1x1x16xf32> to vector<1x1x16xf32>
    %10 = vector.broadcast %9 : vector<1x1x16xf32> to vector<1x16x16xf32>
    %11 = vector.broadcast %cst : f32 to vector<1x16x16xf32>
    %12 = arith.select %6, %10, %11 : vector<1x16x16xi1>, vector<1x16x16xf32>
    %cst_5 = arith.constant dense<0.000000e+00> : vector<1x16xf32>
    %13 = vector.multi_reduction <add>, %12, %cst_5 [2] : vector<1x16x16xf32> to vector<1x16xf32>
    %14 = vector.shape_cast %13 : vector<1x16xf32> to vector<1x16x1xf32>
    %cst_6 = arith.constant 1.000000e+00 : f32
    %15 = vector.broadcast %cst_6 : f32 to vector<1x16x1xf32>
    %16 = arith.maximumf %14, %15 : vector<1x16x1xf32>
    %17 = tpu.reciprocal %16 {approx = true} : vector<1x16x1xf32> -> vector<1x16x1xf32>
    %cst_7 = arith.constant 0.000000e+00 : f32
    %18 = vector.broadcast %cst_7 : f32 to vector<1x16x1xf32>
    %19 = arith.cmpf oeq, %14, %18 : vector<1x16x1xf32>
    %cst_8 = arith.constant 1.000000e+00 : f32
    %cst_9 = arith.constant 0.000000e+00 : f32
    %20 = vector.broadcast %cst_8 : f32 to vector<1x16x1xf32>
    %21 = vector.broadcast %cst_9 : f32 to vector<1x16x1xf32>
    %22 = arith.select %19, %20, %21 : vector<1x16x1xi1>, vector<1x16x1xf32>
    %23 = vector.shape_cast %3 : vector<1x1x16xi1> to vector<1x1x16xi1>
    %24 = vector.broadcast %23 : vector<1x1x16xi1> to vector<1x16x16xi1>
    %25 = vector.shape_cast %17 : vector<1x16x1xf32> to vector<1x16x1xf32>
    %26 = vector.broadcast %25 : vector<1x16x1xf32> to vector<1x16x16xf32>
    %27 = vector.shape_cast %22 : vector<1x16x1xf32> to vector<1x16x1xf32>
    %28 = vector.broadcast %27 : vector<1x16x1xf32> to vector<1x16x16xf32>
    %29 = arith.select %24, %26, %28 : vector<1x16x16xi1>, vector<1x16x16xf32>
    %cst_10 = arith.constant 0.000000e+00 : f32
    %30 = vector.broadcast %cst_10 : f32 to vector<1x16x16xf32>
    %31 = arith.select %6, %29, %30 : vector<1x16x16xi1>, vector<1x16x16xf32>
    %32 = arith.truncf %31 : vector<1x16x16xf32> to vector<1x16x16xbf16>
    %c0_11 = arith.constant 0 : index
    %c0_12 = arith.constant 0 : index
    %c0_13 = arith.constant 0 : index
    %33 = vector.load %arg3[%c0_11, %c0_12, %c0_13] : memref<1x16x768xbf16, #tpu.memory_space<vmem>>, vector<1x16x768xbf16>
    %34 = vector.shape_cast %33 : vector<1x16x768xbf16> to vector<16x768xbf16>
    %c0_14 = arith.constant 0 : index
    %c0_15 = arith.constant 0 : index
    %35 = vector.load %arg4[%c0_14, %c0_15] : memref<768x16xbf16, #tpu.memory_space<vmem>>, vector<768x16xbf16>
    %cst_16 = arith.constant dense<0.000000e+00> : vector<16x16xf32>
    %36 = tpu.matmul %34, %35, %cst_16 {dimension_numbers = #tpu.dot_dimension_numbers<[1], [0], [0], [1], [0, 0, 1, 1], [], []>} : vector<16x768xbf16>, vector<768x16xbf16>, vector<16x16xf32> -> vector<16x16xf32>
    %37 = vector.shape_cast %36 : vector<16x16xf32> to vector<1x16x16xf32>
    %38 = arith.truncf %37 : vector<1x16x16xf32> to vector<1x16x16xbf16>
    "tpu.trace_start"() <{level = 10 : i32, message = "bws,bst->bwt"}> : () -> ()
    %cst_17 = arith.constant dense<0.000000e+00> : vector<1x16x16xf32>
    %39 = tpu.matmul %32, %38, %cst_17 {dimension_numbers = #tpu.dot_dimension_numbers<[2], [1], [1], [2], [0, 0, 0, 1, 1, 2], [0], [0]>} : vector<1x16x16xbf16>, vector<1x16x16xbf16>, vector<1x16x16xf32> -> vector<1x16x16xf32>
    "tpu.trace_stop"() : () -> ()
    %c0_18 = arith.constant 0 : index
    %c0_19 = arith.constant 0 : index
    %40 = vector.load %arg5[%c0_18, %c0_19] : memref<1x16xf32, #tpu.memory_space<vmem>>, vector<1x16xf32>
    %41 = vector.shape_cast %40 : vector<1x16xf32> to vector<1x1x16xf32>
    %42 = vector.broadcast %41 : vector<1x1x16xf32> to vector<1x16x16xf32>
    %43 = arith.addf %39, %42 : vector<1x16x16xf32>
    %c0_20 = arith.constant 0 : index
    %c0_21 = arith.constant 0 : index
    %c0_22 = arith.constant 0 : index
    %44 = vector.load %arg6[%c0_20, %c0_21, %c0_22] : memref<1x16x16xf32, #tpu.memory_space<vmem>>, vector<1x16x16xf32>
    tpu.vector_store %arg6[%c0_20, %c0_21, %c0_22], %43 {strides = array<i32>} : memref<1x16x16xf32, #tpu.memory_space<vmem>>, vector<1x16x16xf32>,
    return
  }
  func.func @transform_0(%arg0: i32) -> (i32, i32, i32) {
    %c0_i32 = arith.constant 0 : i32
    %c0_i32_0 = arith.constant 0 : i32
    %c0_i32_1 = arith.constant 0 : i32
    return %arg0, %c0_i32, %c0_i32_0 : i32, i32, i32
  }
  func.func @transform_1(%arg0: i32) -> (i32, i32, i32) {
    %c0_i32 = arith.constant 0 : i32
    %c0_i32_0 = arith.constant 0 : i32
    %c0_i32_1 = arith.constant 0 : i32
    return %arg0, %c0_i32, %c0_i32_0 : i32, i32, i32
  }
  func.func @transform_2(%arg0: i32) -> (i32, i32, i32) {
    %c0_i32 = arith.constant 0 : i32
    %c0_i32_0 = arith.constant 0 : i32
    %c0_i32_1 = arith.constant 0 : i32
    return %arg0, %c0_i32, %c0_i32_0 : i32, i32, i32
  }
  func.func @transform_3(%arg0: i32) -> (i32, i32) {
    %c0_i32 = arith.constant 0 : i32
    %c0_i32_0 = arith.constant 0 : i32
    %c0_i32_1 = arith.constant 0 : i32
    return %c0_i32, %c0_i32_0 : i32, i32
  }
  func.func @transform_4(%arg0: i32) -> (i32, i32) {
    %c0_i32 = arith.constant 0 : i32
    %c0_i32_0 = arith.constant 0 : i32
    %c0_i32_1 = arith.constant 0 : i32
    return %c0_i32, %c0_i32_0 : i32, i32
  }
  func.func @transform_5(%arg0: i32) -> (i32, i32, i32) {
    %c0_i32 = arith.constant 0 : i32
    %c0_i32_0 = arith.constant 0 : i32
    %c0_i32_1 = arith.constant 0 : i32
    return %arg0, %c0_i32, %c0_i32_0 : i32, i32, i32
  }
}

</mosaic_0001>

<bundles_post_ra>
// kernel: tpu_custom_call.1
= control target key start
LH: loop header
LB: loop body
LE: loop exit
PB: predicated region body
PF: predicated region fallthrough
CT: control target
= control target key end

     0   :  { %10 = vsyncpa [#allocation3], 0  ;;  %s1654_s0 = inlined_call_operand.vmem [shape: s32[2,1,16], index: 0, kind: input, shape index: {}]   ;;  %s1655_s1 = inlined_call_operand.vmem [shape: s32[2,1,16], index: 1, kind: input, shape index: {}]   ;;  %s1656_s2 = inlined_call_operand.vmem [shape: bf16[2,16,768], index: 2, kind: input, shape index: {}]   ;;  %s1657_s3 = inlined_call_operand.vmem [shape: bf16[768,16], index: 3, kind: input, shape index: {}]   ;;  %s1658_s4 = inlined_call_operand.vmem [shape: f32[1,16], index: 4, kind: input, shape index: {}]   ;;  %s1659_s5 = inlined_call_operand.hbm [shape: f32[2,16,16], index: 5, kind: output, shape index: {}]  }
   0x1   :  { %12 = vsyncpa [#allocation3 + $0x1], 0  ;;  %s1359_s18 = smov 0   ;;  %s1361_s19 = smov 0  }
   0x2   :  { %s1363_s20 = smov 0   ;;  %s1365_s21 = smov 0  }
   0x3 LB: > { %s1380_s22 = sadd.s32 4294967295, %s1323_s21   ;;  %s927_s23 = sadd.s32 4294967294, %s1323_s21   ;;  %s1323_s21 = sphi %s1365_s21, %s1665_s21   ;;  %s1319_s20 = sphi %s1363_s20, %s1664_s20   ;;  %s1315_s19 = sphi %s1361_s19, %s1663_s19   ;;  %s1311_s18 = sphi %s1359_s18, %s1662_s18  }
   0x4   : > { %s1384_s24 = sadd.s32 1, %s1323_s21   ;;  %s145_s25 = sadd.s32 1, %s1319_s20 }
   0x5   : > { %s142_s26 = ssub.s32 %s1323_s21, %s1384_s24  ;;  %p155_p0 = scmp.ne.s32.totalorder %s1319_s20, %s1315_s19 }
   0x6   : > { %p143_p1 = scmp.eq.s32.totalorder %s142_s26, 0  ;;  %p156_p2 = scmp.eq.s32.totalorder %s1380_s22, 1 }
   0x7   : > { %p161_p3 = scmp.ne.s32.totalorder %s1315_s19, %s1311_s18  ;;  %p162_p4 = scmp.eq.s32.totalorder %s927_s23, 1 }
   0x8   : > { %s1395_s27 = scalar_select %p143_p1, %s1319_s20, %s145_s25  }
   0x9   : > { %p1397_p5 = por %p156_p2, %p155_p0  ;;  %p1401_p6 = por %p162_p4, %p161_p3 }
   0xa   : > { %p930_p7 = scmp.ge.s32.totalorder %s1323_s21, 1  ;;  %p206_p8 = scmp.lt.s32.totalorder %s1323_s21, 3 }
   0xc   : > { %p207_p9 = pnand %p930_p7, %p206_p8 }
   0xd   : > { %p240_p10 = scmp.lt.s32.totalorder (!%p207_p9), %s1380_s22, 1  ;;  %s1210_s6 = sshll.u32 (!%p207_p9), %s1380_s22, 4 }
   0xe   : > { %210 = sbr.rel (%p207_p9) target bundleno = 376 (0x178), region = 40  ;;  %s843_s10 = scalar_lea.hbm (!%p207_p9), %s1659_s5, %s1210_s6 }
   0xf   : > { %s846_s14 = sshll.u32 (!%p207_p9), %s843_s10, 4  ;;  %s847_s14 = int_to_ptr.hbm [resolvable:$true] %s846_s14 }
  0x10   : > { %s1275_s16 = sshra.s32 (!%p207_p9), %s847_s14, 4  ;;  %s1276_s16 = int_to_ptr.hbm [resolvable:$true] %s1275_s16 }
  0x11   : > { %p1282_p0 = scmp.lt.s32.totalorder (!%p207_p9), %s1276_s16, %s1659_s5 }
  0x13   : > { %v1169_v0 = vld [vmem:[%s1657_s3 + $0x38] sm:$0xff]  ;;  %v1168_v4 = vld [vmem:[%s1657_s3 + $0x30] sm:$0xff]  ;;  %v1167_v8 = vld [vmem:[%s1657_s3 + $0x28] sm:$0xff]  ;;  %s1457_s30 = scalar_select %p240_p10, %s1380_s22, 1  ;;  %v255_v20 = vlaneseq  ;;  %v1325_v28 = vmov 0.0   ;;  %vm268_vm2 = vcmask 130048  }
  0x14   : > { %v1177_v1 = vld [vmem:[%s1657_s3 + $0x78] sm:$0xff]  ;;  %711 = vmatpush.bf16.msra.mxu0 %v1169_v0  ;;  %v1176_v5 = vld [vmem:[%s1657_s3 + $0x70] sm:$0xff]  ;;  %v1175_v9 = vld [vmem:[%s1657_s3 + $0x68] sm:$0xff]  ;;  %s1277_s22 = scalar_lea.hbm %s1276_s16, 16 }
  0x15   : > { %v1185_v2 = vld [vmem:[%s1657_s3 + $0xb8] sm:$0xff]  ;;  %725 = vmatpush.bf16.msra.mxu1 %v1177_v1  ;;  %v1184_v6 = vld [vmem:[%s1657_s3 + $0xb0] sm:$0xff]  ;;  %v1183_v10 = vld [vmem:[%s1657_s3 + $0xa8] sm:$0xff]  ;;  %s245_s12 = scalar_lea.vmem %s1655_s1, %s1457_s30  ;;  %s242_s25 = scalar_lea.vmem %s1654_s0, %s1457_s30  ;;  %v1484_v23 = vshrl.u32 %v255_v20, 7 }
  0x16   : > { %v1193_v3 = vld [vmem:[%s1657_s3 + $0xf8] sm:$0xff]  ;;  %739 = vmatpush.bf16.msra.mxu2 %v1185_v2  ;;  %v1192_v7 = vld [vmem:[%s1657_s3 + $0xf0] sm:$0xff]  ;;  %v1191_v11 = vld [vmem:[%s1657_s3 + $0xe8] sm:$0xff]  ;;  %s1211_s13 = smul.u32 48, %s1457_s30  ;;  %p1278_p11 = scmp.ne.s32.totalorder %s1276_s16, %s1277_s22 }
  0x17   : > { %753 = vmatpush.bf16.msra.mxu3 %v1193_v3  ;;  %v1166_v12 = vld [vmem:[%s1657_s3 + $0x20] sm:$0xff]  ;;  %v1165_v16 = vld [vmem:[%s1657_s3 + $0x18] sm:$0xff]  ;;  %v1164_v21 = vld [vmem:[%s1657_s3 + $0x10] sm:$0xff]  ;;  %v1539_v42 = vadd.s32 8, %v1484_v23  ;;  %s1281_s30 = scalar_lea.hbm %s1659_s5, 32 }
  0x18   : > { %712 = vmatpush.bf16.msra.mxu0 %v1168_v4  ;;  %v1174_v13 = vld [vmem:[%s1657_s3 + $0x60] sm:$0xff]  ;;  %v1173_v17 = vld [vmem:[%s1657_s3 + $0x58] sm:$0xff]  ;;  %v1172_v24 = vld [vmem:[%s1657_s3 + $0x50] sm:$0xff]  ;;  %p1279_p12 = pnand %p1278_p11, %p1397_p5  ;;  %p1283_p1 = scmp.lt.s32.totalorder %s1281_s30, %s1277_s22 }
  0x19   : > { %726 = vmatpush.bf16.msra.mxu1 %v1176_v5  ;;  %v1182_v14 = vld [vmem:[%s1657_s3 + $0xa0] sm:$0xff]  ;;  %v1181_v18 = vld [vmem:[%s1657_s3 + $0x98] sm:$0xff]  ;;  %v1180_v26 = vld [vmem:[%s1657_s3 + $0x90] sm:$0xff] }
  0x1a   : > { %740 = vmatpush.bf16.msra.mxu2 %v1184_v6  ;;  %v1190_v15 = vld [vmem:[%s1657_s3 + $0xe0] sm:$0xff]  ;;  %v1189_v19 = vld [vmem:[%s1657_s3 + $0xd8] sm:$0xff]  ;;  %v1188_v27 = vld [vmem:[%s1657_s3 + $0xd0] sm:$0xff]  ;;  %p1280_p13 = pneg %p1279_p12  ;;  %p1284_p2 = por %p1283_p1, %p1282_p0 }
  0x1b   : > { %754 = vmatpush.bf16.msra.mxu3 %v1192_v7  ;;  %v1482_v22 = vld [vmem:[%s245_s12] sm:$0x1]  ;;  %v1163_v31 = vld [vmem:[%s1657_s3 + $0x8] sm:$0xff]  ;;  %s1529_s12 = scalar_lea.vmem %s1656_s2, %s1211_s13  ;;  %v1201_v40 = vld [vmem:[%s1657_s3 + $0x138] sm:$0xff] }
  0x1c   : > { %713 = vmatpush.bf16.msra.mxu0 %v1167_v8  ;;  %vm254_vm0 = vcmp.gt.s32.totalorder %v1482_v22, 0  ;;  %v1490_v25 = vld [vmem:[%s242_s25] ss:$0 sm:$0xff]  ;;  %v1171_v32 = vld [vmem:[%s1657_s3 + $0x48] sm:$0xff]  ;;  %v1159_v43 = vld [vmem:[%s1529_s12 + $0x14] sm:$0xf0]  ;;  %p1285_p3 = pnand %p1284_p2, %p1280_p13 }
  0x1d   : > { %727 = vmatpush.bf16.msra.mxu1 %v1175_v9  ;;  %v933_v29 = vsel %vm254_vm0, 1.0, %v1325_v28  ;;  %vm259_vm1 = vcmp.eq.s32.totalorder %v1484_v23, %v1490_v25  ;;  %v1179_v34 = vld [vmem:[%s1657_s3 + $0x88] sm:$0xff]  ;;  %v1162_v37 = vld [vmem:[%s1657_s3] sm:$0xff]  ;;  %v938_v45 = vld [vmem:[%s1529_s12 + $0x18] sm:$0xf0]  ;;  %vm260_vm3 = vcmp.eq.s32.totalorder %v1539_v42, %v1490_v25 }
  0x1e   : > { %741 = vmatpush.bf16.msra.mxu2 %v1183_v10  ;;  %v264_v30 = vperm.slane %v933_v29, 0  ;;  %v1187_v35 = vld [vmem:[%s1657_s3 + $0xc8] sm:$0xff]  ;;  %v1170_v38 = vld [vmem:[%s1657_s3 + $0x40] sm:$0xff]  ;;  %v1209_v46 = vld [vmem:[%s1657_s3 + $0x178] sm:$0xff]  ;;  %v1326_v29 = vmov 0  }
  0x1f   : > { %755 = vmatpush.bf16.msra.mxu3 %v1191_v11  ;;  %v1178_v39 = vld [vmem:[%s1657_s3 + $0x80] sm:$0xff]  ;;  %v944_v47 = vld [vmem:[%s1529_s12 + $0x8] sm:$0xf]  ;;  %v1157_v50 = vld [vmem:[%s1529_s12 + $0xc] sm:$0xf] }
  0x20   : > { %714 = vmatpush.bf16.msra.mxu0 %v1166_v12  ;;  %v266_v33 = vsel %vm259_vm1, %v264_v30, 0.0  ;;  %v936_v41 = vld [vmem:[%s1529_s12] sm:$0xf]  ;;  %v1156_v44 = vld [vmem:[%s1529_s12 + $0x4] sm:$0xf]  ;;  %v267_v54 = vsel %vm260_vm3, %v264_v30, 0.0 }
  0x21   : > { %728 = vmatpush.bf16.msra.mxu1 %v1174_v13  ;;  %v269_v36 = vsel %vm268_vm2, %v266_v33, 0.0  ;;  %v1160_v48 = vld [vmem:[%s1529_s12 + $0x1c] sm:$0xf0]  ;;  %v946_v51 = vld [vmem:[%s1529_s12 + $0x20] sm:$0xf0]  ;;  %v937_v52 = vor.u32 %v1159_v43, %v936_v41  ;;  %v941_v53 = vor.u32 %v1156_v44, %v938_v45  ;;  %v1200_v56 = vld [vmem:[%s1657_s3 + $0x130] sm:$0xff] }
  0x22   : > { %742 = vmatpush.bf16.msra.mxu2 %v1182_v14  ;;  %270 = vadd.xlane.f32.xlu0 %v269_v36  ;;  %v1186_v49 = vld [vmem:[%s1657_s3 + $0xc0] sm:$0xff]  ;;  %v945_v55 = vor.u32 %v1160_v48, %v944_v47  ;;  %v949_v57 = vor.u32 %v1157_v50, %v946_v51  ;;  %v272_v58 = vsel %vm268_vm2, %v267_v54, 0.0  ;;  %v1208_v59 = vld [vmem:[%s1657_s3 + $0x170] sm:$0xff]  ;;  %v1199_v60 = vld [vmem:[%s1657_s3 + $0x128] sm:$0xff]  ;;  %v261_v30 = vsel %vm254_vm0, 1, %v1326_v29 }
  0x23   : > { %756 = vmatpush.bf16.msra.mxu3 %v1190_v15  ;;  %v1207_v61 = vld [vmem:[%s1657_s3 + $0x168] sm:$0xff]  ;;  %v1198_v62 = vld [vmem:[%s1657_s3 + $0x120] sm:$0xff]  ;;  %v1197_v0 = vld [vmem:[%s1657_s3 + $0x118] sm:$0xff] }
  0x24   : > { %715 = vmatpush.bf16.msra.mxu0 %v1165_v16  ;;  %v1206_v63 = vld [vmem:[%s1657_s3 + $0x160] sm:$0xff]  ;;  %v1205_v1 = vld [vmem:[%s1657_s3 + $0x158] sm:$0xff]  ;;  %v1196_v2 = vld [vmem:[%s1657_s3 + $0x110] sm:$0xff] }
  0x25   : > { %729 = vmatpush.bf16.msra.mxu1 %v1173_v17  ;;  %v1204_v3 = vld [vmem:[%s1657_s3 + $0x150] sm:$0xff]  ;;  %v1195_v4 = vld [vmem:[%s1657_s3 + $0x108] sm:$0xff]  ;;  %v1194_v6 = vld [vmem:[%s1657_s3 + $0x100] sm:$0xff] }
  0x26   : > { %743 = vmatpush.bf16.msra.mxu2 %v1181_v18  ;;  %v1203_v5 = vld [vmem:[%s1657_s3 + $0x148] sm:$0xff]  ;;  %v952_v7 = vld [vmem:[%s1529_s12 + $0x10] sm:$0xf]  ;;  %v1202_v9 = vld [vmem:[%s1657_s3 + $0x140] sm:$0xff] }
  0x27   : > { %757 = vmatpush.bf16.msra.mxu3 %v1189_v19  ;;  %v1161_v8 = vld [vmem:[%s1529_s12 + $0x24] sm:$0xf0]  ;;  %v1158_v10 = vld [vmem:[%s1529_s12 + $0x14] sm:$0xf]  ;;  %v954_v11 = vld [vmem:[%s1529_s12 + $0x28] sm:$0xf0] }
  0x28   : > { %716 = vmatpush.bf16.msra.mxu0 %v1164_v21  ;;  %v953_v12 = vor.u32 %v1161_v8, %v952_v7  ;;  %v957_v13 = vor.u32 %v1158_v10, %v954_v11  ;;  %s237_s12 = sand.u32 1, %s1315_s19   ;;  %v1256_v25 = vld [vmem:[%s1658_s4] ss:$0 sm:$0xff] }
  0x29   : > { %730 = vmatpush.bf16.msra.mxu1 %v1172_v24  ;;  %s931_s23 = sshll.u32 %s237_s12, 4  ;;  %s832_s15 = scalar_lea.sflag [#allocation3], %s237_s12 }
  0x2a   : > { %744 = vmatpush.bf16.msra.mxu2 %v1180_v26  ;;  %273 = vadd.xlane.f32.xlu0 %v272_v58  ;;  %s239_s7 = scalar_lea.vmem [#allocation2], %s931_s23 }
  0x2b   : > { %758 = vmatpush.bf16.msra.mxu3 %v1188_v27  ;;  %s844_s11 = sshll.u32 %s239_s7, 4  ;;  %s845_s11 = int_to_ptr.vmem [resolvable:$true] %s844_s11 }
  0x2c   : > { %717 = vmatpush.bf16.msra.mxu0 %v1163_v31 }
  0x2d   : > { %731 = vmatpush.bf16.msra.mxu1 %v1171_v32  ;;  %v283_v32 = vperm.slane %v261_v30, 0 }
  0x2e   : > { %745 = vmatpush.bf16.msra.mxu2 %v1179_v34 }
  0x2f   : > { %759 = vmatpush.bf16.msra.mxu3 %v1187_v35  ;;  %vm284_vm6 = vcmp.eq.s32.totalorder %v283_v32, 1 }
  0x30   : > { %718 = vmatpush.bf16.msra.mxu0 %v1162_v37 }
  0x31   : > { %732 = vmatpush.bf16.msra.mxu1 %v1170_v38 }
  0x32   : > { %746 = vmatpush.bf16.msra.mxu2 %v1178_v39 }
  0x33   : > { %760 = vmatpush.bf16.msra.mxu3 %v1186_v49  ;;  %719 = vmatmul.bf16.vlgmr.msra.gmra.mxu0 %v937_v52 }
  0x34   : > { %767 = vmatpush.bf16.msrb.mxu0 %v1201_v40  ;;  %733 = vmatmul.bf16.vlgmr.msra.gmra.mxu1 %v941_v53 }
  0x35   : > { %781 = vmatpush.bf16.msrb.mxu1 %v1209_v46  ;;  %747 = vmatmul.bf16.vlgmr.msra.gmra.mxu2 %v945_v55 }
  0x36   : > { %761 = vmatmul.bf16.vlgmr.msra.gmra.mxu3 %v949_v57 }
  0x38   : > { %768 = vmatpush.bf16.msrb.mxu0 %v1200_v56 }
  0x39   : > { %782 = vmatpush.bf16.msrb.mxu1 %v1208_v59 }
  0x3c   : > { %769 = vmatpush.bf16.msrb.mxu0 %v1199_v60 }
  0x3d   : > { %783 = vmatpush.bf16.msrb.mxu1 %v1207_v61 }
  0x40   : > { %770 = vmatpush.bf16.msrb.mxu0 %v1198_v62 }
  0x41   : > { %784 = vmatpush.bf16.msrb.mxu1 %v1206_v63 }
  0x44   : > { %771 = vmatpush.bf16.msrb.mxu0 %v1197_v0 }
  0x45   : > { %785 = vmatpush.bf16.msrb.mxu1 %v1205_v1 }
  0x48   : > { %772 = vmatpush.bf16.msrb.mxu0 %v1196_v2 }
  0x49   : > { %786 = vmatpush.bf16.msrb.mxu1 %v1204_v3 }
  0x4c   : > { %773 = vmatpush.bf16.msrb.mxu0 %v1195_v4 }
  0x4d   : > { %787 = vmatpush.bf16.msrb.mxu1 %v1203_v5 }
  0x50   : > { %774 = vmatpush.bf16.msrb.mxu0 %v1194_v6 }
  0x51   : > { %788 = vmatpush.bf16.msrb.mxu1 %v1202_v9 }
  0x53   : > { %775 = vmatmul.bf16.vlgmr.msrb.gmra.mxu0 %v953_v12 }
  0x54   : > { %789 = vmatmul.bf16.vlgmr.msrb.gmra.mxu1 %v957_v13 }
  0x95   : > { %v271_v14 = vpop.xlane.xlu0 %270 }
  0x96   : > { %v275_v20 = vmax.f32 %v271_v14, 1.0  ;;  %vm279_vm4 = vcmp.eq.f32.partialorder %v271_v14, 0.0 }
  0x97   : > { %v281_v41 = vsel %vm279_vm4, 1.0, %v1325_v28 }
  0x98   : > { %1257 = vrcp.f32 %v275_v20 }
  0x9d   : > { %v274_v18 = vpop.xlane.xlu0 %273 }
  0x9e   : > { %v276_v26 = vmax.f32 %v274_v18, 1.0  ;;  %vm280_vm5 = vcmp.eq.f32.partialorder %v274_v18, 0.0  ;;  %v1258_v38 = vpop.eup %1257 }
  0x9f   : > { %v282_v22 = vsel %vm280_vm5, 1.0, %v1325_v28  ;;  %v285_v45 = vsel %vm284_vm6, %v1258_v38, %v281_v41 }
  0xa0   : > { %1259 = vrcp.f32 %v276_v26  ;;  %v287_v50 = vsel %vm259_vm1, %v285_v45, 0.0 }
  0xa1   : > { %v289_v28 = vpack.c.bf16 %v287_v50, %v287_v50 }
  0xa3   : > { %v803_v60 = vunpack.c.l.b16 %v289_v28 }
  0xa6   : > { %v1260_v39 = vpop.eup %1259 }
  0xa7   : > { %v286_v46 = vsel %vm284_vm6, %v1260_v39, %v282_v22 }
  0xa8   : > { %v288_v51 = vsel %vm260_vm3, %v286_v46, 0.0 }
  0xa9   : > { %v290_v56 = vpack.c.bf16 %v288_v51, %v288_v51 }
  0xab   : > { %v804_v61 = vunpack.c.l.b16 %v290_v56 }
  0xad   : > { %v805_v23 = vpack.c.b16 %v804_v61, %v803_v60 }
  0xb0   : > { %v720_v15 = vpop.f32.mrf.mxu0 }
  0xb1   : > { %v734_v16 = vpop.f32.mrf.mxu1 }
  0xb2   : > { %v735_v21 = vadd.f32 %v734_v16, %v720_v15 }
  0xb8   : > { %v748_v17 = vpop.f32.mrf.mxu2  ;;  %v722_v19 = vpop.f32.mrf.mxu0 }
  0xb9   : > { %v736_v24 = vpop.f32.mrf.mxu1  ;;  %v762_v27 = vpop.f32.mrf.mxu3  ;;  %v749_v31 = vadd.f32 %v748_v17, %v735_v21 }
  0xba   : > { %v737_v33 = vadd.f32 %v736_v24, %v722_v19 }
  0xbb   : > { %v763_v36 = vadd.f32 %v762_v27, %v749_v31 }
  0xc0   : > { %v750_v34 = vpop.f32.mrf.mxu2 }
  0xc1   : > { %v751_v40 = vadd.f32 %v750_v34, %v737_v33  ;;  %v764_v44 = vpop.f32.mrf.mxu3 }
  0xc3   : > { %v765_v47 = vadd.f32 %v764_v44, %v751_v40 }
  0xd0   : > { %v776_v35 = vpop.f32.mrf.mxu0 }
  0xd1   : > { %v790_v37 = vpop.f32.mrf.mxu1  ;;  %v777_v43 = vadd.f32 %v776_v35, %v763_v36 }
  0xd3   : > { %v791_v48 = vadd.f32 %v790_v37, %v777_v43 }
  0xd5   : > { %v795_v54 = vpack.c.bf16 %v791_v48, %v791_v48 }
  0xd7   : > { %v808_v58 = vunpack.c.l.b16 %v795_v54 }
  0xd8   : > { %v778_v49 = vpop.f32.mrf.mxu0 }
  0xd9   : > { %v779_v52 = vadd.f32 %v778_v49, %v765_v47  ;;  %v792_v53 = vpop.f32.mrf.mxu1 }
  0xdb   : > { %v793_v55 = vadd.f32 %v792_v53, %v779_v52 }
  0xdd   : > { %v796_v57 = vpack.c.bf16 %v793_v55, %v793_v55 }
  0xdf   : > { %v809_v59 = vunpack.c.l.b16 %v796_v57 }
  0xe1   : > { %v810_v62 = vpack.c.b16 %v809_v59, %v808_v58 }
  0xe3   : > { %822 = vmatpush.bf16.msrb.mxu2 %v810_v62 }
  0xe6   : > { %1150 = vmatmul.msk.bf16.vlgmr.msrb.gmra.mxu2 %vm268_vm2, %v805_v23 }
 0x169   : > { %v824_v42 = vpop.f32.mrf.mxu2 }
 0x16a   : > { %v825_v63 = vadd.f32 %v1256_v25, %v824_v42 }
 0x16c   : > { %829 = vst.msk [vmem:[%s239_s7] sm:$0xff] %vm268_vm2, %v825_v63 }
 0x171   : > { %v826_v0 = vpop.f32.mrf.mxu2 }
 0x172   : > { %v827_v1 = vadd.f32 %v1256_v25, %v826_v0 }
 0x174   : > { %830 = vst.msk [vmem:[%s239_s7 + $0x8] sm:$0xff] %vm268_vm2, %v827_v1 }
 0x175   : > { %1288 = shalt.err (!%p1285_p3)
}
 0x176   : > { %s1327_s12 = smov 128   ;;  %s1328_s26 = smov 8  }
 0x177   : > { %1212 = dma.vmem_to_hbm [thread:$0]  (%p1397_p5), %s845_s11, 256, %s847_s14, %s832_s15, %s1327_s12, %s1327_s12, %s1328_s26  }
 0x178 PF: > { %p1218_p4 = scmp.ge.s32.totalorder %s1323_s21, 2  ;;  %s861_s6 = sand.u32 1, %s1311_s18  }
 0x179   : > { %s862_s7 = scalar_lea.sflag [#allocation3], %s861_s6 }
 0x17a   : > { %p1215_p7 = pnand %p1218_p4, %p1401_p6 }
 0x17c   : > { %p1216_p8 = pneg %p1215_p7 }
 0x17e   : > { %1306 = dma.done.wait (%p1216_p8), %s862_s7, 256  }
 0x17f   : > { %1308 = vsyncadd (%p1216_p8), %s862_s7, 4294967040  ;;  %p15_p9 = scmp.ge.s32.totalorder %s1384_s24, 4   ;;  %s1662_s18 = smov %s1315_s19 }
 0x180   : > { %s1663_s19 = smov %s1319_s20  ;;  %s1664_s20 = smov %s1395_s27 }
 0x181   : > { %s1665_s21 = smov %s1384_s24  ;;  %17 = sbr.rel (!%p15_p9) target bundleno = 3 (0x3), region = 81 }
 0x186   :  { %868 = vsyncpa [#allocation3], 1 }
 0x187   :  { %870 = vsyncpa [#allocation3 + $0x1], 1 }

</bundles_post_ra>
